<compile_context>
chip_gen: v7x
topology: tpu7x:2x2x1
jax: 0.10.0
libtpu: 0.0.40
codegen_flags: <defaults>
</compile_context>

<pallas_src>
import functools

import jax
import jax.numpy as jnp
from jax.experimental import pallas as pl
from jax.experimental.pallas import tpu as pltpu

_LANE_TARGET = 512                  # fold images along lanes up to this width
_VMEM_BUDGET = 10 * 1024 * 1024     # bytes: 3 arrays x double-buffer per step


def _dir_rhs_kernel(u_ref, f_ref, o_ref, *, H, W, cof, value):
    """Block layout: (rows = imgs_per_step * H, cols = nc * W)."""
    u = u_ref[...].astype(jnp.float32)
    f = f_ref[...].astype(jnp.float32)
    R, CW = u.shape

    # Per-image coordinates; boundary ring of every packed image is masked.
    row = jax.lax.broadcasted_iota(jnp.int32, (R, CW), 0) % H
    col = jax.lax.broadcasted_iota(jnp.int32, (R, CW), 1) % W
    interior = (row >= 1) & (row <= H - 2) & (col >= 1) & (col <= W - 2)

    # Dirichlet value on the boundary ring.
    u_mod = jnp.where(interior, u, jnp.float32(value))

    # 5-point stencil via XLU rotations (non-negative shifts only).
    # Circular wraparound and cross-image neighbors only contaminate boundary
    # positions, which are zeroed by the interior mask below.
    up    = pltpu.roll(u_mod, shift=1,      axis=0)
    down  = pltpu.roll(u_mod, shift=R - 1,  axis=0)
    left  = pltpu.roll(u_mod, shift=1,      axis=1)
    right = pltpu.roll(u_mod, shift=CW - 1, axis=1)
    lap = up + down + left + right - 4.0 * u_mod

    rhs = lap - jnp.float32(cof) * f
    o_ref[...] = jnp.where(interior, rhs, jnp.float32(0.0)).astype(o_ref.dtype)


def _choose_packing(N, H, W, itemsize):
    """Pick (nc, nr, imgs_per_step): images folded along lanes / rows / grid."""
    nc = 1
    if W < 128:
        for d in range(N, 0, -1):
            if N % d == 0 and d * W <= _LANE_TARGET:
                nc = d
                break
    nr = N // nc
    cw = nc * W

    per_image = 6 * H * cw * itemsize            # u, f, out x double buffering
    max_imgs = max(1, _VMEM_BUDGET // max(per_image, 1))
    if nr >= 2:
        # keep grid extent >= 2 so v7x can shard the grid across both TCs
        max_imgs = min(max_imgs, max(1, nr // 2))
    imgs = max(1, min(nr, max_imgs))
    while nr % imgs != 0:                        # must tile the row axis evenly
        imgs -= 1
    return nc, nr, imgs


def dir_rhs(u, f, *, k, h, value):
    """u, f: (N, C, H, W) with C == 1 (matches the module default in_channels=1)."""
    N, C, H, W = u.shape
    assert C == 1, "kernel implemented for in_channels=1 (module default)"
    assert H >= 3 and W >= 3, "need at least a 1-cell interior (3x3 conv, pad=0)"
    # TODO(synk): in_channels > 1 would need a channel-summed conv plus
    # PyTorch-style broadcast of the 1-channel conv result against (N,C,..) f.

    itemsize = jnp.dtype(u.dtype).itemsize
    nc, nr, imgs_per_step = _choose_packing(N, H, W, itemsize)
    cw = nc * W
    tile_r = imgs_per_step * H
    grid_n = nr // imgs_per_step

    # Pack (N,H,W) -> (nr*H, nc*W): image n = r*nc + q lives at rows
    # [r*H, r*H+H), cols [q*W, q*W+W).  Lane-dense + many images per grid step.
    def pack(x):
        x3 = x.reshape(N, H, W)
        if nc == 1:
            return x3.reshape(nr * H, W)
        return x3.reshape(nr, nc, H, W).transpose(0, 2, 1, 3).reshape(nr * H, cw)

    u2 = pack(u)
    f2 = pack(f)

    cof = float(h) ** 2 / float(k)
    kernel = functools.partial(_dir_rhs_kernel, H=H, W=W, cof=cof,
                               value=float(value))

    # Raise scoped VMEM only if one image alone overruns the budget
    # (defaults: 16 MiB v5e / 32 MiB v6e,v7x; 64 MiB physical on v7x).
    # TODO(synk): huge single images (>~64 MiB working set) would need
    # halo-row tiling of H instead of whole-image row blocks.
    need = 6 * tile_r * cw * itemsize
    vmem_limit = min(need + (2 << 20), 64 << 20) if need > (14 << 20) else None

    cost = pl.CostEstimate(
        flops=8 * N * H * W,
        transcendentals=0,
        bytes_accessed=3 * N * H * W * itemsize,
    )

    out2 = pl.pallas_call(
        kernel,
        out_shape=jax.ShapeDtypeStruct((nr * H, cw), u.dtype),
        grid=(grid_n,),
        in_specs=[
            pl.BlockSpec((tile_r, cw), lambda g: (g, 0)),
            pl.BlockSpec((tile_r, cw), lambda g: (g, 0)),
        ],
        out_specs=pl.BlockSpec((tile_r, cw), lambda g: (g, 0)),
        compiler_params=pltpu.CompilerParams(
            dimension_semantics=("parallel",),
            vmem_limit_bytes=vmem_limit,
        ),
        cost_estimate=cost,
    )(u2, f2)

    # Unpack back to (N, C, H, W).
    if nc == 1:
        out3 = out2.reshape(N, H, W)
    else:
        out3 = out2.reshape(nr, H, nc, W).transpose(0, 2, 1, 3).reshape(N, H, W)
    return out3.reshape(N, C, H, W)


def _dir_rhs_reference(u, f, *, k, h, value):
    """Pure-JAX reference mirroring the PyTorch forward (for verification)."""
    N, C, H, W = u.shape
    interior = jnp.zeros((H, W), bool).at[1:-1, 1:-1].set(True)
    u_mod = jnp.where(interior, u, value)
    lap = (u_mod[..., :-2, 1:-1] + u_mod[..., 2:, 1:-1]
           + u_mod[..., 1:-1, :-2] + u_mod[..., 1:-1, 2:]
           - 4.0 * u_mod[..., 1:-1, 1:-1])
    cof = h ** 2 / k
    rhs = lap - (cof * f)[..., 1:-1, 1:-1]
    return jnp.pad(rhs, ((0, 0), (0, 0), (1, 1), (1, 1)))


if __name__ == "__main__":
    key = jax.random.PRNGKey(0)
    k1, k2 = jax.random.split(key)

    N, C, H, W = 2, 1, 16, 16
    u = jax.random.normal(k1, (N, C, H, W), dtype=jnp.float32)
    f = jax.random.normal(k2, (N, C, H, W), dtype=jnp.float32)

    k_coef, h_coef, value = 1.0, 0.1, 0.5

    out = dir_rhs(u, f, k=k_coef, h=h_coef, value=value)
    jax.block_until_ready(out)

    ref = _dir_rhs_reference(u, f, k=k_coef, h=h_coef, value=value)
    assert out.shape == (N, C, H, W)
    assert jnp.allclose(out, ref, atol=1e-5, rtol=1e-5)

    print("KERNEL_OK")
</pallas_src>

<mosaic_0001>
module attributes {stable_mosaic.version = 11 : i64} {
  func.func @_dir_rhs_kernel(%arg0: i32, %arg1: memref<16x32xf32, #tpu.memory_space<vmem>>, %arg2: memref<16x32xf32, #tpu.memory_space<vmem>>, %arg3: memref<16x32xf32, #tpu.memory_space<vmem>>) attributes {dimension_semantics = [#tpu.dimension_semantics<parallel>], iteration_bounds = array<i64: 1>, scalar_prefetch = 0 : i64, scratch_operands = 0 : i64, tpu.core_type = #tpu.core_type<tc>, window_params = [{transform_indices = @transform_0, window_bounds = array<i64: 16, 32>}, {transform_indices = @transform_1, window_bounds = array<i64: 16, 32>}, {transform_indices = @transform_2, window_bounds = array<i64: 16, 32>}]} {
    %c0 = arith.constant 0 : index
    %c0_0 = arith.constant 0 : index
    %0 = vector.load %arg1[%c0, %c0_0] : memref<16x32xf32, #tpu.memory_space<vmem>>, vector<16x32xf32>
    %c0_1 = arith.constant 0 : index
    %c0_2 = arith.constant 0 : index
    %1 = vector.load %arg2[%c0_1, %c0_2] : memref<16x32xf32, #tpu.memory_space<vmem>>, vector<16x32xf32>
    %2 = tpu.iota {dimensions = array<i32: 0>} : vector<16x32xi32>
    %c16_i32 = arith.constant 16 : i32
    %c0_i32 = arith.constant 0 : i32
    %3 = arith.cmpi eq, %c16_i32, %c0_i32 : i32
    %c1_i32 = arith.constant 1 : i32
    %4 = arith.select %3, %c1_i32, %c16_i32 : i32
    %5 = vector.broadcast %4 : i32 to vector<16x32xi32>
    %6 = arith.remsi %2, %5 : vector<16x32xi32>
    %c0_i32_3 = arith.constant 0 : i32
    %7 = vector.broadcast %c0_i32_3 : i32 to vector<16x32xi32>
    %8 = arith.cmpi ne, %6, %7 : vector<16x32xi32>
    %c0_i32_4 = arith.constant 0 : i32
    %9 = vector.broadcast %c0_i32_4 : i32 to vector<16x32xi32>
    %10 = arith.cmpi slt, %6, %9 : vector<16x32xi32>
    %c0_i32_5 = arith.constant 0 : i32
    %11 = arith.cmpi slt, %4, %c0_i32_5 : i32
    %12 = vector.broadcast %11 : i1 to vector<16x32xi1>
    %13 = vector.broadcast %12 : vector<16x32xi1> to vector<16x32xi1>
    %14 = arith.xori %10, %13 : vector<16x32xi1>
    %15 = arith.andi %14, %8 : vector<16x32xi1>
    %16 = vector.broadcast %4 : i32 to vector<16x32xi32>
    %17 = arith.addi %6, %16 : vector<16x32xi32>
    %18 = arith.select %15, %17, %6 : vector<16x32xi1>, vector<16x32xi32>
    %19 = tpu.iota {dimensions = array<i32: 1>} : vector<16x32xi32>
    %c16_i32_6 = arith.constant 16 : i32
    %c0_i32_7 = arith.constant 0 : i32
    %20 = arith.cmpi eq, %c16_i32_6, %c0_i32_7 : i32
    %c1_i32_8 = arith.constant 1 : i32
    %21 = arith.select %20, %c1_i32_8, %c16_i32_6 : i32
    %22 = vector.broadcast %21 : i32 to vector<16x32xi32>
    %23 = arith.remsi %19, %22 : vector<16x32xi32>
    %c0_i32_9 = arith.constant 0 : i32
    %24 = vector.broadcast %c0_i32_9 : i32 to vector<16x32xi32>
    %25 = arith.cmpi ne, %23, %24 : vector<16x32xi32>
    %c0_i32_10 = arith.constant 0 : i32
    %26 = vector.broadcast %c0_i32_10 : i32 to vector<16x32xi32>
    %27 = arith.cmpi slt, %23, %26 : vector<16x32xi32>
    %c0_i32_11 = arith.constant 0 : i32
    %28 = arith.cmpi slt, %21, %c0_i32_11 : i32
    %29 = vector.broadcast %28 : i1 to vector<16x32xi1>
    %30 = vector.broadcast %29 : vector<16x32xi1> to vector<16x32xi1>
    %31 = arith.xori %27, %30 : vector<16x32xi1>
    %32 = arith.andi %31, %25 : vector<16x32xi1>
    %33 = vector.broadcast %21 : i32 to vector<16x32xi32>
    %34 = arith.addi %23, %33 : vector<16x32xi32>
    %35 = arith.select %32, %34, %23 : vector<16x32xi1>, vector<16x32xi32>
    %c1_i32_12 = arith.constant 1 : i32
    %36 = vector.broadcast %c1_i32_12 : i32 to vector<16x32xi32>
    %37 = arith.cmpi sge, %18, %36 : vector<16x32xi32>
    %c14_i32 = arith.constant 14 : i32
    %38 = vector.broadcast %c14_i32 : i32 to vector<16x32xi32>
    %39 = arith.cmpi sle, %18, %38 : vector<16x32xi32>
    %40 = arith.andi %37, %39 : vector<16x32xi1>
    %c1_i32_13 = arith.constant 1 : i32
    %41 = vector.broadcast %c1_i32_13 : i32 to vector<16x32xi32>
    %42 = arith.cmpi sge, %35, %41 : vector<16x32xi32>
    %43 = arith.andi %40, %42 : vector<16x32xi1>
    %c14_i32_14 = arith.constant 14 : i32
    %44 = vector.broadcast %c14_i32_14 : i32 to vector<16x32xi32>
    %45 = arith.cmpi sle, %35, %44 : vector<16x32xi32>
    %46 = arith.andi %43, %45 : vector<16x32xi1>
    %cst = arith.constant 5.000000e-01 : f32
    %47 = vector.broadcast %cst : f32 to vector<16x32xf32>
    %48 = arith.select %46, %0, %47 : vector<16x32xi1>, vector<16x32xf32>
    %c1_i32_15 = arith.constant 1 : i32
    %49 = tpu.dynamic_rotate %48 by %c1_i32_15 dim 0 : vector<16x32xf32>, i32 -> vector<16x32xf32>
    %c15_i32 = arith.constant 15 : i32
    %50 = tpu.dynamic_rotate %48 by %c15_i32 dim 0 : vector<16x32xf32>, i32 -> vector<16x32xf32>
    %c1_i32_16 = arith.constant 1 : i32
    %51 = tpu.dynamic_rotate %48 by %c1_i32_16 dim 1 : vector<16x32xf32>, i32 -> vector<16x32xf32>
    %c31_i32 = arith.constant 31 : i32
    %52 = tpu.dynamic_rotate %48 by %c31_i32 dim 1 : vector<16x32xf32>, i32 -> vector<16x32xf32>
    %53 = arith.addf %49, %50 : vector<16x32xf32>
    %54 = arith.addf %53, %51 : vector<16x32xf32>
    %55 = arith.addf %54, %52 : vector<16x32xf32>
    %cst_17 = arith.constant 4.000000e+00 : f32
    %56 = vector.broadcast %cst_17 : f32 to vector<16x32xf32>
    %57 = arith.mulf %56, %48 : vector<16x32xf32>
    %58 = arith.subf %55, %57 : vector<16x32xf32>
    %cst_18 = arith.constant 0.00999999977 : f32
    %59 = vector.broadcast %cst_18 : f32 to vector<16x32xf32>
    %60 = arith.mulf %59, %1 : vector<16x32xf32>
    %61 = arith.subf %58, %60 : vector<16x32xf32>
    %cst_19 = arith.constant 0.000000e+00 : f32
    %62 = vector.broadcast %cst_19 : f32 to vector<16x32xf32>
    %63 = arith.select %46, %61, %62 : vector<16x32xi1>, vector<16x32xf32>
    %c0_20 = arith.constant 0 : index
    %c0_21 = arith.constant 0 : index
    %64 = vector.load %arg3[%c0_20, %c0_21] : memref<16x32xf32, #tpu.memory_space<vmem>>, vector<16x32xf32>
    tpu.vector_store %arg3[%c0_20, %c0_21], %63 {strides = array<i32>} : memref<16x32xf32, #tpu.memory_space<vmem>>, vector<16x32xf32>,
    return
  }
  func.func @transform_0(%arg0: i32) -> (i32, i32) {
    %c0_i32 = arith.constant 0 : i32
    %c0_i32_0 = arith.constant 0 : i32
    return %arg0, %c0_i32 : i32, i32
  }
  func.func @transform_1(%arg0: i32) -> (i32, i32) {
    %c0_i32 = arith.constant 0 : i32
    %c0_i32_0 = arith.constant 0 : i32
    return %arg0, %c0_i32 : i32, i32
  }
  func.func @transform_2(%arg0: i32) -> (i32, i32) {
    %c0_i32 = arith.constant 0 : i32
    %c0_i32_0 = arith.constant 0 : i32
    return %arg0, %c0_i32 : i32, i32
  }
}

</mosaic_0001>

<bundles_post_ra>
// kernel: tpu_custom_call.1
= control target key start
LH: loop header
LB: loop body
LE: loop exit
PB: predicated region body
PF: predicated region fallthrough
CT: control target
= control target key end

     0   :  { %7 = vsyncpa [#allocation3], 0  ;;  %s337_s0 = inlined_call_operand.hbm [shape: f32[16,32], index: 0, kind: input, shape index: {}]   ;;  %s338_s1 = inlined_call_operand.hbm [shape: f32[16,32], index: 1, kind: input, shape index: {}]   ;;  %s339_s2 = inlined_call_operand.hbm [shape: f32[16,32], index: 2, kind: output, shape index: {}]  }
   0x1   :  { %8 = vsyncpa [#allocation6], 0 }
   0x2   :  { %9 = vsyncpa [#allocation4], 0  ;;  %s253_s9 = smov [#allocation2]   ;;  %s181_s13 = scalar_lea.hbm %s337_s0, 256 }
   0x3   :  { %s15_s10 = sshll.u32 %s253_s9, 4  ;;  %p182_p0 = scmp.ne.s32.totalorder %s337_s0, %s181_s13  ;;  %s16_s10 = int_to_ptr.vmem [resolvable:$true] %s15_s10 }
   0x4   :  { %p185_p1 = scmp.lt.u32.totalorder %s181_s13, %s337_s0 }
   0x6   :  { %p187_p2 = pnand %p185_p1, %p182_p0 }
   0x8   :  { %190 = shalt.err (!%p187_p2)
}
   0x9   :  { %s191_s18 = scalar_lea.vmem %s16_s10, 256  ;;  %p196_p4 = scmp.lt.s32.totalorder %s16_s10, %s16_s10 }
   0xa   :  { %p192_p3 = scmp.ne.s32.totalorder %s16_s10, %s191_s18  ;;  %p197_p5 = scmp.lt.s32.totalorder %s191_s18, %s191_s18 }
   0xc   :  { %p198_p6 = por %p197_p5, %p196_p4 }
   0xe   :  { %p199_p7 = pnand %p198_p6, %p192_p3 }
  0x10   :  { %202 = shalt.err (!%p199_p7)
}
  0x11   :  { %s254_s19 = smov 128   ;;  %s255_s20 = smov 8  }
  0x12   :  { %21 = dma.hbm_to_vmem [thread:$0]  %s337_s0, 256, %s16_s10, [#allocation3], %s254_s19, %s254_s19, %s255_s20  }
  0x13   :  { %s256_s23 = smov [#allocation5]   ;;  %s203_s27 = scalar_lea.hbm %s338_s1, 256 }
  0x14   :  { %s27_s24 = sshll.u32 %s256_s23, 4  ;;  %p204_p8 = scmp.ne.s32.totalorder %s338_s1, %s203_s27  ;;  %s28_s24 = int_to_ptr.vmem [resolvable:$true] %s27_s24 }
  0x15   :  { %p207_p9 = scmp.lt.u32.totalorder %s203_s27, %s338_s1 }
  0x17   :  { %p209_p10 = pnand %p207_p9, %p204_p8 }
  0x19   :  { %212 = shalt.err (!%p209_p10)
}
  0x1a   :  { %s213_s4 = scalar_lea.vmem %s28_s24, 256  ;;  %p218_p12 = scmp.lt.s32.totalorder %s28_s24, %s28_s24 }
  0x1b   :  { %p214_p11 = scmp.ne.s32.totalorder %s28_s24, %s213_s4  ;;  %p219_p13 = scmp.lt.s32.totalorder %s213_s4, %s213_s4 }
  0x1d   :  { %p220_p0 = por %p219_p13, %p218_p12 }
  0x1f   :  { %p221_p1 = pnand %p220_p0, %p214_p11 }
  0x21   :  { %224 = shalt.err (!%p221_p1)
}
  0x22   :  { %33 = dma.hbm_to_vmem [thread:$0]  %s338_s1, 256, %s28_s24, [#allocation6], %s254_s19, %s254_s19, %s255_s20  }
  0x23   :  { %247 = dma.done.wait [#allocation3], 256  }
  0x24   :  { %248 = vsyncadd [#allocation3], 4294967040 }
  0x25   :  { %249 = dma.done.wait [#allocation6], 256  }
  0x26   :  { %250 = vsyncadd [#allocation6], 4294967040  ;;  %v44_v0 = vlaneseq  ;;  %v40_v7 = vld [vmem:[#allocation2] sm:$0xff]  ;;  %v41_v9 = vld [vmem:[#allocation2 + $0x8] sm:$0xff]  ;;  %s257_s1 = smov 32   ;;  %vm109_vm8 = vcmask 1047808  }
  0x27   :  { %s258_s6 = smov 97   ;;  %s259_s7 = smov 127   ;;  %v42_v31 = vld [vmem:[#allocation5] sm:$0xff]  ;;  %v43_v39 = vld [vmem:[#allocation5 + $0x8] sm:$0xff]  ;;  %vm152_vm11 = vcmask 261120  }
  0x28   :  { %v45_v1 = vshrl.u32 %v44_v0, 7  ;;  %v72_v2 = vand.u32 127, %v44_v0  ;;  %v146_v37 = vmul.f32 0.01, %v42_v31  ;;  %v147_v45 = vmul.f32 0.01, %v43_v39 }
  0x29   :  { %s260_s8 = smov [#allocation7]  }
  0x2a   :  { %v51_v3 = vand.u32 15, %v45_v1  ;;  %v77_v4 = vand.u32 15, %v72_v2  ;;  %v46_v5 = vadd.s32 8, %v45_v1  ;;  %vm101_vm9 = vcmp.lt.s32.totalorder %v45_v1, 1  ;;  %s160_s9 = sshll.u32 %s260_s8, 4  ;;  %s161_s9 = int_to_ptr.vmem [resolvable:$true] %s160_s9 }
  0x2b   :  { %vm106_vm10 = vcmp.lt.s32.totalorder %v45_v1, 7  ;;  %s225_s10 = scalar_lea.vmem %s161_s9, 256  ;;  %p230_p3 = scmp.lt.s32.totalorder %s161_s9, %s161_s9 }
  0x2c   :  { %vm85_vm0 = vcmp.ge.s32.totalorder %v51_v3, 1  ;;  %vm91_vm1 = vcmp.ge.s32.totalorder %v77_v4, 1  ;;  %vm94_vm2 = vcmp.le.s32.totalorder %v77_v4, 14  ;;  %v58_v6 = vand.u32 15, %v46_v5  ;;  %p226_p2 = scmp.ne.s32.totalorder %s161_s9, %s225_s10  ;;  %p231_p4 = scmp.lt.s32.totalorder %s225_s10, %s225_s10 }
  0x2d   :  { %vm92_vm3 = vmand %vm85_vm0, %vm91_vm1 }
  0x2e   :  { %vm306_vm4 = vmand %vm92_vm3, %vm94_vm2  ;;  %vm88_vm5 = vcmp.le.s32.totalorder %v58_v6, 14  ;;  %p232_p5 = por %p231_p4, %p230_p3 }
  0x2f   :  { %v97_v10 = vsel %vm306_vm4, %v40_v7, 0.5  ;;  %vm93_vm6 = vmand %vm88_vm5, %vm91_vm1 }
  0x30   :  { %110 = vrot.lane.b32.xlu0 %v97_v10, %s257_s1  ;;  %vm312_vm7 = vmand %vm93_vm6, %vm94_vm2  ;;  %v99_v23 = vrot.slane %v97_v10, 7  ;;  %v104_v24 = vrot.slane %v97_v10, 1  ;;  %v142_v34 = vmul.f32 4.0, %v97_v10  ;;  %p233_p6 = pnand %p232_p5, %p226_p2 }
  0x31   :  { %v98_v12 = vsel %vm312_vm7, %v41_v9, 0.5 }
  0x32   :  { %v100_v21 = vrot.slane %v98_v12, 7  ;;  %v105_v22 = vrot.slane %v98_v12, 1  ;;  %v143_v42 = vmul.f32 4.0, %v98_v12 }
  0x34   :  { %113 = vrot.lane.b32.xlu0 %v98_v12, %s257_s1  ;;  %v103_v25 = vsel %vm101_vm9, %v100_v21, %v99_v23  ;;  %v107_v26 = vsel %vm106_vm10, %v104_v24, %v105_v22  ;;  %v102_v29 = vsel %vm101_vm9, %v99_v23, %v100_v21  ;;  %v108_v30 = vsel %vm106_vm10, %v105_v22, %v104_v24 }
  0x35   :  { %v122_v27 = vadd.f32 %v107_v26, %v103_v25  ;;  %v123_v33 = vadd.f32 %v108_v30, %v102_v29 }
  0xa2   :  { %v111_v13 = vpop.permute.xlu0 %110 }
  0xa3   :  { %v112_v14 = vsel %vm109_vm8, %v111_v13, %v97_v10 }
  0xa4   :  { %116 = vrot.lane.b32.xlu1 %v112_v14, %s257_s1 }
  0xa6   :  { %v114_v15 = vpop.permute.xlu0 %113 }
  0xa7   :  { %v115_v16 = vsel %vm109_vm8, %v114_v15, %v98_v12 }
  0xa8   :  { %118 = vrot.lane.b32.xlu1 %v115_v16, %s257_s1 }
 0x116   :  { %v117_v17 = vpop.permute.xlu1 %116 }
 0x117   :  { %v120_v18 = vsel %vm109_vm8, %v117_v17, %v97_v10 }
 0x118   :  { %126 = vrot.lane.b32.xlu0 %v120_v18, %s258_s6 }
 0x11a   :  { %v119_v19 = vpop.permute.xlu1 %118 }
 0x11b   :  { %v121_v20 = vsel %vm109_vm8, %v119_v19, %v98_v12 }
 0x11c   :  { %134 = vrot.lane.b32.xlu0 %v120_v18, %s259_s7  ;;  %128 = vrot.lane.b32.xlu1 %v121_v20, %s258_s6 }
 0x120   :  { %136 = vrot.lane.b32.xlu1 %v121_v20, %s259_s7 }
 0x18a   :  { %v127_v28 = vpop.permute.xlu0 %126 }
 0x18b   :  { %v132_v32 = vadd.f32 %v127_v28, %v122_v27 }
 0x18e   :  { %v129_v35 = vpop.permute.xlu1 %128  ;;  %v135_v36 = vpop.permute.xlu0 %134 }
 0x18f   :  { %v140_v38 = vadd.f32 %v135_v36, %v132_v32  ;;  %v133_v40 = vadd.f32 %v129_v35, %v123_v33 }
 0x191   :  { %v144_v41 = vsub.f32 %v140_v38, %v142_v34 }
 0x192   :  { %v137_v43 = vpop.permute.xlu1 %136 }
 0x193   :  { %v148_v44 = vsub.f32 %v144_v41, %v146_v37  ;;  %v141_v46 = vadd.f32 %v137_v43, %v133_v40 }
 0x195   :  { %v145_v47 = vsub.f32 %v141_v46, %v143_v42  ;;  %v150_v48 = vsel %vm306_vm4, %v148_v44, 0.0 }
 0x196   :  { %153 = vst.msk [vmem:[#allocation7] sm:$0xff] %vm152_vm11, %v150_v48 }
 0x197   :  { %v149_v49 = vsub.f32 %v145_v47, %v147_v45 }
 0x199   :  { %v151_v50 = vsel %vm312_vm7, %v149_v49, 0.0 }
 0x19a   :  { %154 = vst.msk [vmem:[#allocation7 + $0x8] sm:$0xff] %vm152_vm11, %v151_v50 }
 0x19b   :  { %236 = shalt.err (!%p233_p6)
}
 0x19c   :  { %s237_s13 = scalar_lea.hbm %s339_s2, 256 }
 0x19d   :  { %p238_p7 = scmp.ne.s32.totalorder %s339_s2, %s237_s13  ;;  %p241_p8 = scmp.lt.u32.totalorder %s237_s13, %s339_s2 }
 0x19f   :  { %p243_p9 = pnand %p241_p8, %p238_p7 }
 0x1a1   :  { %246 = shalt.err (!%p243_p9)
}
 0x1a2   :  { %166 = dma.vmem_to_hbm [thread:$0]  %s161_s9, 256, %s339_s2, [#allocation4], %s254_s19, %s254_s19, %s255_s20  }
 0x1a3   :  { %251 = dma.done.wait [#allocation4], 256  }
 0x1a4   :  { %252 = vsyncadd [#allocation4], 4294967040 }
 0x1a5   :  { %170 = vsyncpa [#allocation3], 1 }
 0x1a6   :  { %171 = vsyncpa [#allocation6], 1 }
 0x1a7   :  { %172 = vsyncpa [#allocation4], 1 }

</bundles_post_ra>
